<compile_context>
chip_gen: v6e
topology: v6e:2x2x1
jax: 0.10.0
libtpu: 0.0.40
codegen_flags: <defaults>
</compile_context>

<pallas_src>
import functools
import math

import jax
import jax.numpy as jnp
from jax.experimental import pallas as pl
from jax.experimental.pallas import tpu as pltpu


def _round_up(v: int, m: int) -> int:
    return ((v + m - 1) // m) * m


# --- fused sincos -----------------------------------------------------------
# Cody-Waite split of pi/2 chosen so that k * HI and k * MID are exact f32
# products for |k| up to ~1.7e3 (i.e. |arg| up to ~2.5e3, covering diffusion
# timesteps by a wide margin; beyond that the error grows as ~6e-8 * |arg|).
_TWO_OVER_PI = 2.0 / math.pi
_PIO2_HI = round((math.pi / 2.0) * 8192.0) / 8192.0                 # 12868 * 2^-13
_PIO2_MID = round((math.pi / 2.0 - _PIO2_HI) * (2.0 ** 31)) / (2.0 ** 31)
_PIO2_LO = math.pi / 2.0 - _PIO2_HI - _PIO2_MID

# cephes sinf/cosf minimax coefficients, |r| <= pi/4, ~1e-7 accuracy.
_S1, _S2, _S3 = -1.6666654611e-1, 8.3321608736e-3, -1.9515295891e-4
_C1, _C2, _C3 = 4.166664568298827e-2, -1.388731625493765e-3, 2.443315711809948e-5


def _fast_sincos(t):
    """(sin(t), cos(t)) in f32 with a single shared range reduction."""
    k = jnp.floor(t * _TWO_OVER_PI + 0.5)
    r = ((t - k * _PIO2_HI) - k * _PIO2_MID) - k * _PIO2_LO
    q = k.astype(jnp.int32) & 3
    r2 = r * r
    s = r + r * r2 * (_S1 + r2 * (_S2 + r2 * _S3))
    c = 1.0 + r2 * (-0.5 + r2 * (_C1 + r2 * (_C2 + r2 * _C3)))
    swap = (q & 1) == 1
    sin_t = jnp.where(swap, c, s)
    cos_t = jnp.where(swap, s, c)
    sin_t = jnp.where(q >= 2, -sin_t, sin_t)
    cos_t = jnp.where((q == 1) | (q == 2), -cos_t, cos_t)
    return sin_t, cos_t


def _sinusoidal_kernel(x_ref, out_ref, *, dim: int, half_dim: int,
                       scale: float, fast_sincos: bool):
    """Writes one (TILE_N, dim) output tile.

    x_ref:   (TILE_N, 1)   float32 timesteps.
    out_ref: (TILE_N, dim) output tile; [:, :half_dim]=sin, [:, half_dim:]=cos.
    """
    x = x_ref[...]                                                   # (T, 1) f32

    if half_dim % 128 == 0:
        # Production embedding dims: both half-stores are lane-dense vst.
        j = jax.lax.broadcasted_iota(jnp.int32, (1, half_dim), 1).astype(jnp.float32)
        freqs = jnp.exp(j * (-scale))                                # (1, H) f32  (EUP)
        emb = x * freqs                                              # (T, H) f32  (VPU)
        if fast_sincos:
            s, c = _fast_sincos(emb)                                 # shared reduction
        else:
            s, c = jnp.sin(emb), jnp.cos(emb)
        out_ref[:, :half_dim] = s.astype(out_ref.dtype)
        out_ref[:, half_dim:] = c.astype(out_ref.dtype)
    else:
        # half_dim not lane-aligned: one full-width pass, ONE dense store.
        # cos(t) = sin(t + pi/2): fold sin/cos into a single sin with a phase.
        j = jax.lax.broadcasted_iota(jnp.int32, (1, dim), 1)
        jm = jnp.where(j >= half_dim, j - half_dim, j).astype(jnp.float32)
        freqs2 = jnp.exp(jm * (-scale))                              # (1, D) f32
        phase = jnp.where(j >= half_dim,
                          jnp.float32(math.pi / 2.0), jnp.float32(0.0))
        t = x * freqs2 + phase                                       # (T, D) f32
        if fast_sincos:
            s, _ = _fast_sincos(t)
        else:
            s = jnp.sin(t)
        out_ref[...] = s.astype(out_ref.dtype)


def sinusoidal_pos_emb(x: jax.Array, dim: int, *, tile_n: int = 512,
                       fast_sincos: bool = True) -> jax.Array:
    """Pallas TPU implementation of SinusoidalPosEmb.forward.

    x: (N,) array of positions / timesteps (float or int).
    returns: (N, dim) array, concat(sin, cos) along the last dim.
    """
    assert x.ndim == 1, "x must be a 1-D vector of positions"
    assert dim % 2 == 0, "dim must be even"
    half_dim = dim // 2
    assert half_dim > 1, "half_dim == 1 divides by zero in the PyTorch formula"
    n = x.shape[0]

    # Compute the sin/cos argument in float32; output dtype mirrors the PyTorch
    # module for float inputs (bf16 in -> bf16 out also halves HBM writes).
    xf = x.astype(jnp.float32).reshape(n, 1)
    out_dtype = x.dtype if jnp.issubdtype(x.dtype, jnp.floating) else jnp.float32

    # Row tiling (multiple of 8 sublanes).
    tn = min(tile_n, _round_up(n, 8))
    # Guarantee >=2 grid steps when possible so the "parallel" axis shards
    # across both TensorCores on v7x (neutral on v5e/v6e single-TC chips).
    if n > 8:
        tn = min(tn, _round_up(pl.cdiv(n, 2), 8))
    # v7x VMEM cap (64 MiB phys / 32 MiB scoped default): double-buffered f32
    # output + ~3x f32 in-flight intermediates ~= tn*dim*4*5 bytes.
    vmem_budget = 24 * 1024 * 1024
    tn_cap = max(8, (vmem_budget // (dim * 4 * 5)) // 8 * 8)
    tn = max(8, min(tn, tn_cap))

    scale = math.log(10000.0) / (half_dim - 1)
    kernel = functools.partial(_sinusoidal_kernel, dim=dim, half_dim=half_dim,
                               scale=scale, fast_sincos=fast_sincos)

    # No pad / slice: non-divisible grids are boundary-masked by Mosaic, so the
    # kernel stays at the output-write roofline (no extra (N, dim) HBM copy).
    return pl.pallas_call(
        kernel,
        out_shape=jax.ShapeDtypeStruct((n, dim), out_dtype),
        grid=(pl.cdiv(n, tn),),
        in_specs=[pl.BlockSpec((tn, 1), lambda i: (i, 0))],
        out_specs=pl.BlockSpec((tn, dim), lambda i: (i, 0)),
        compiler_params=pltpu.CompilerParams(
            dimension_semantics=("parallel",),
        ),
    )(xf)


def _reference(x: jax.Array, dim: int) -> jax.Array:
    half_dim = dim // 2
    scale = math.log(10000.0) / (half_dim - 1)
    freqs = jnp.exp(jnp.arange(half_dim, dtype=jnp.float32) * -scale)
    emb = x.astype(jnp.float32)[:, None] * freqs[None, :]
    out = jnp.concatenate([jnp.sin(emb), jnp.cos(emb)], axis=-1)
    out_dtype = x.dtype if jnp.issubdtype(x.dtype, jnp.floating) else jnp.float32
    return out.astype(out_dtype)


if __name__ == "__main__":
    key = jax.random.PRNGKey(0)
    N = 8
    DIM = 256  # half_dim = 128 -> lane-aligned two-store path
    # Diffusion-style timesteps in [0, 1000).
    x = jax.random.uniform(key, (N,), dtype=jnp.float32) * 1000.0

    out = jax.block_until_ready(sinusoidal_pos_emb(x, DIM))
    ref = _reference(x, DIM)
    assert out.shape == (N, DIM), out.shape
    assert out.dtype == x.dtype, out.dtype
    assert jnp.allclose(out, ref, atol=1e-3, rtol=1e-3), float(jnp.max(jnp.abs(out - ref)))

    # Non-divisible grid (boundary-masked tile, no pad/slice) + 2-step grid.
    x2 = jax.random.uniform(jax.random.PRNGKey(1), (37,), dtype=jnp.float32) * 1000.0
    out2 = jax.block_until_ready(sinusoidal_pos_emb(x2, DIM, tile_n=16))
    ref2 = _reference(x2, DIM)
    assert out2.shape == (37, DIM), out2.shape
    assert jnp.allclose(out2, ref2, atol=1e-3, rtol=1e-3), float(jnp.max(jnp.abs(out2 - ref2)))

    # Non-lane-aligned half_dim -> single full-width sin(x*f + phase) store.
    x3 = jax.random.uniform(jax.random.PRNGKey(2), (16,), dtype=jnp.float32) * 1000.0
    DIM3 = 96
    out3 = jax.block_until_ready(sinusoidal_pos_emb(x3, DIM3))
    ref3 = _reference(x3, DIM3)
    assert out3.shape == (16, DIM3), out3.shape
    assert jnp.allclose(out3, ref3, atol=1e-3, rtol=1e-3), float(jnp.max(jnp.abs(out3 - ref3)))

    print("KERNEL_OK")
</pallas_src>

<mosaic_0001>
module attributes {stable_mosaic.version = 11 : i64} {
  func.func @_sinusoidal_kernel(%arg0: i32, %arg1: memref<8x1xf32, #tpu.memory_space<vmem>>, %arg2: memref<8x256xf32, #tpu.memory_space<vmem>>) attributes {dimension_semantics = [#tpu.dimension_semantics<parallel>], iteration_bounds = array<i64: 1>, scalar_prefetch = 0 : i64, scratch_operands = 0 : i64, tpu.core_type = #tpu.core_type<tc>, window_params = [{transform_indices = @transform_0, window_bounds = array<i64: 8, 1>}, {transform_indices = @transform_1, window_bounds = array<i64: 8, 256>}]} {
    %c0 = arith.constant 0 : index
    %c0_0 = arith.constant 0 : index
    %0 = vector.load %arg1[%c0, %c0_0] : memref<8x1xf32, #tpu.memory_space<vmem>>, vector<8x1xf32>
    %1 = tpu.iota {dimensions = array<i32: 1>} : vector<1x128xi32>
    %2 = arith.sitofp %1 : vector<1x128xi32> to vector<1x128xf32>
    %cst = arith.constant -0.0725223646 : f32
    %3 = vector.broadcast %cst : f32 to vector<1x128xf32>
    %4 = arith.mulf %2, %3 : vector<1x128xf32>
    %5 = math.exp %4 : vector<1x128xf32>
    %6 = vector.broadcast %0 : vector<8x1xf32> to vector<8x128xf32>
    %7 = vector.broadcast %5 : vector<1x128xf32> to vector<8x128xf32>
    %8 = arith.mulf %6, %7 : vector<8x128xf32>
    %cst_1 = arith.constant 0.636619746 : f32
    %9 = vector.broadcast %cst_1 : f32 to vector<8x128xf32>
    %10 = arith.mulf %8, %9 : vector<8x128xf32>
    %cst_2 = arith.constant 5.000000e-01 : f32
    %11 = vector.broadcast %cst_2 : f32 to vector<8x128xf32>
    %12 = arith.addf %10, %11 : vector<8x128xf32>
    %13 = math.floor %12 : vector<8x128xf32>
    %cst_3 = arith.constant 1.57080078 : f32
    %14 = vector.broadcast %cst_3 : f32 to vector<8x128xf32>
    %15 = arith.mulf %13, %14 : vector<8x128xf32>
    %16 = arith.subf %8, %15 : vector<8x128xf32>
    %cst_4 = arith.constant -4.45451587E-6 : f32
    %17 = vector.broadcast %cst_4 : f32 to vector<8x128xf32>
    %18 = arith.mulf %13, %17 : vector<8x128xf32>
    %19 = arith.subf %16, %18 : vector<8x128xf32>
    %cst_5 = arith.constant 6.07709438E-11 : f32
    %20 = vector.broadcast %cst_5 : f32 to vector<8x128xf32>
    %21 = arith.mulf %13, %20 : vector<8x128xf32>
    %22 = arith.subf %19, %21 : vector<8x128xf32>
    %23 = arith.fptosi %13 : vector<8x128xf32> to vector<8x128xi32>
    %c3_i32 = arith.constant 3 : i32
    %24 = vector.broadcast %c3_i32 : i32 to vector<8x128xi32>
    %25 = arith.andi %23, %24 : vector<8x128xi32>
    %26 = arith.mulf %22, %22 : vector<8x128xf32>
    %27 = arith.mulf %22, %26 : vector<8x128xf32>
    %cst_6 = arith.constant -1.95152956E-4 : f32
    %28 = vector.broadcast %cst_6 : f32 to vector<8x128xf32>
    %29 = arith.mulf %26, %28 : vector<8x128xf32>
    %cst_7 = arith.constant 0.00833216123 : f32
    %30 = vector.broadcast %cst_7 : f32 to vector<8x128xf32>
    %31 = arith.addf %30, %29 : vector<8x128xf32>
    %32 = arith.mulf %26, %31 : vector<8x128xf32>
    %cst_8 = arith.constant -0.166666552 : f32
    %33 = vector.broadcast %cst_8 : f32 to vector<8x128xf32>
    %34 = arith.addf %33, %32 : vector<8x128xf32>
    %35 = arith.mulf %27, %34 : vector<8x128xf32>
    %36 = arith.addf %22, %35 : vector<8x128xf32>
    %cst_9 = arith.constant 2.44331568E-5 : f32
    %37 = vector.broadcast %cst_9 : f32 to vector<8x128xf32>
    %38 = arith.mulf %26, %37 : vector<8x128xf32>
    %cst_10 = arith.constant -0.00138873165 : f32
    %39 = vector.broadcast %cst_10 : f32 to vector<8x128xf32>
    %40 = arith.addf %39, %38 : vector<8x128xf32>
    %41 = arith.mulf %26, %40 : vector<8x128xf32>
    %cst_11 = arith.constant 0.0416666456 : f32
    %42 = vector.broadcast %cst_11 : f32 to vector<8x128xf32>
    %43 = arith.addf %42, %41 : vector<8x128xf32>
    %44 = arith.mulf %26, %43 : vector<8x128xf32>
    %cst_12 = arith.constant -5.000000e-01 : f32
    %45 = vector.broadcast %cst_12 : f32 to vector<8x128xf32>
    %46 = arith.addf %45, %44 : vector<8x128xf32>
    %47 = arith.mulf %26, %46 : vector<8x128xf32>
    %cst_13 = arith.constant 1.000000e+00 : f32
    %48 = vector.broadcast %cst_13 : f32 to vector<8x128xf32>
    %49 = arith.addf %48, %47 : vector<8x128xf32>
    %c1_i32 = arith.constant 1 : i32
    %50 = vector.broadcast %c1_i32 : i32 to vector<8x128xi32>
    %51 = arith.andi %25, %50 : vector<8x128xi32>
    %c1_i32_14 = arith.constant 1 : i32
    %52 = vector.broadcast %c1_i32_14 : i32 to vector<8x128xi32>
    %53 = arith.cmpi eq, %51, %52 : vector<8x128xi32>
    %54 = arith.select %53, %49, %36 : vector<8x128xi1>, vector<8x128xf32>
    %55 = arith.select %53, %36, %49 : vector<8x128xi1>, vector<8x128xf32>
    %c2_i32 = arith.constant 2 : i32
    %56 = vector.broadcast %c2_i32 : i32 to vector<8x128xi32>
    %57 = arith.cmpi sge, %25, %56 : vector<8x128xi32>
    %cst_15 = arith.constant 0.000000e+00 : f32
    %58 = vector.broadcast %cst_15 : f32 to vector<8x128xf32>
    %59 = arith.subf %58, %54 : vector<8x128xf32>
    %60 = arith.select %57, %59, %54 : vector<8x128xi1>, vector<8x128xf32>
    %c1_i32_16 = arith.constant 1 : i32
    %61 = vector.broadcast %c1_i32_16 : i32 to vector<8x128xi32>
    %62 = arith.cmpi eq, %25, %61 : vector<8x128xi32>
    %c2_i32_17 = arith.constant 2 : i32
    %63 = vector.broadcast %c2_i32_17 : i32 to vector<8x128xi32>
    %64 = arith.cmpi eq, %25, %63 : vector<8x128xi32>
    %65 = arith.ori %62, %64 : vector<8x128xi1>
    %cst_18 = arith.constant 0.000000e+00 : f32
    %66 = vector.broadcast %cst_18 : f32 to vector<8x128xf32>
    %67 = arith.subf %66, %55 : vector<8x128xf32>
    %68 = arith.select %65, %67, %55 : vector<8x128xi1>, vector<8x128xf32>
    %c0_19 = arith.constant 0 : index
    %c0_20 = arith.constant 0 : index
    %69 = vector.load %arg2[%c0_19, %c0_20] : memref<8x256xf32, #tpu.memory_space<vmem>>, vector<8x128xf32>
    tpu.vector_store %arg2[%c0_19, %c0_20], %60 {strides = array<i32>} : memref<8x256xf32, #tpu.memory_space<vmem>>, vector<8x128xf32>,
    %c0_21 = arith.constant 0 : index
    %c128 = arith.constant 128 : index
    %70 = vector.load %arg2[%c0_21, %c128] : memref<8x256xf32, #tpu.memory_space<vmem>>, vector<8x128xf32>
    tpu.vector_store %arg2[%c0_21, %c128], %68 {strides = array<i32>} : memref<8x256xf32, #tpu.memory_space<vmem>>, vector<8x128xf32>,
    return
  }
  func.func @transform_0(%arg0: i32) -> (i32, i32) {
    %c0_i32 = arith.constant 0 : i32
    %c0_i32_0 = arith.constant 0 : i32
    return %arg0, %c0_i32 : i32, i32
  }
  func.func @transform_1(%arg0: i32) -> (i32, i32) {
    %c0_i32 = arith.constant 0 : i32
    %c0_i32_0 = arith.constant 0 : i32
    return %arg0, %c0_i32 : i32, i32
  }
}

</mosaic_0001>

<bundles_post_ra>
// kernel: tpu_custom_call.1
= control target key start
LH: loop header
LB: loop body
LE: loop exit
PB: predicated region body
PF: predicated region fallthrough
CT: control target
= control target key end

     0   :  { %s124_s0 = inlined_call_operand.vmem [shape: f32[8,1], index: 0, kind: input, shape index: {}]   ;;  %s125_s1 = inlined_call_operand.hbm [shape: f32[8,256], index: 1, kind: output, shape index: {}]  }
   0x1   :  { %v9_v0 = vld [vmem:[%s124_s0] sm:$0xff] }
   0x2   :  { %6 = vsyncpa [#allocation3], 0  ;;  %v106_v1 = vmov 0   ;;  %v10_v2 = vlaneseq  ;;  %s107_s0 = smov [#allocation2]  }
   0x3   :  { %81 = vset.pattern.permute.xlu0 %v106_v1  ;;  %s69_s8 = sshll.u32 %s107_s0, 4  ;;  %s70_s8 = int_to_ptr.vmem [resolvable:$true] %s69_s8 }
   0x4   :  { %18 = vperm.xlu0 %81, %v9_v0   ;;  %v11_v3 = vand.u32 127, %v10_v2  ;;  %s84_s9 = scalar_lea.vmem %s70_s8, 256  ;;  %p89_p1 = scmp.lt.s32.totalorder %s70_s8, %s70_s8 }
   0x5   :  { %p85_p0 = scmp.ne.s32.totalorder %s70_s8, %s84_s9  ;;  %p90_p2 = scmp.lt.s32.totalorder %s84_s9, %s84_s9 }
   0x6   :  { %v12_v4 = vcvt.s32.f32 %v11_v3 }
   0x7   :  { %p91_p3 = por %p90_p2, %p89_p1 }
   0x8   :  { %v13_v5 = vmul.f32 -0.072522365, %v12_v4 }
   0x9   :  { %p92_p4 = pnand %p91_p3, %p85_p0 }
   0xa   :  { %v14_v6 = vmul.f32 1.442695, %v13_v5 }
   0xc   :  { %82 = vpow2.f32 %v14_v6 }
  0x19   :  { %v83_v7 = vpop.eup %82 }
  0x7f   :  { %v19_v8 = vpop.permute.xlu0 %18 }
  0x80   :  { %v21_v9 = vmul.f32 %v83_v7, %v19_v8 }
  0x82   :  { %v22_v10 = vmul.f32 0.63661975, %v21_v9 }
  0x84   :  { %v23_v11 = vadd.f32 0.5, %v22_v10 }
  0x86   :  { %v24_v12 = vfloor.f32 %v23_v11 }
  0x88   :  { %v25_v13 = vmul.f32 1.5708008, %v24_v12  ;;  %v27_v15 = vmul.f32 -4.454516e-06, %v24_v12  ;;  %v29_v17 = vmul.f32 6.0770944e-11, %v24_v12  ;;  %v77_v20 = vtrunc.f32 %v24_v12 }
  0x8a   :  { %v26_v14 = vsub.f32 %v21_v9, %v25_v13  ;;  %v78_v25 = vcvt.f32.s32 %v77_v20 }
  0x8c   :  { %v28_v16 = vsub.f32 %v26_v14, %v27_v15  ;;  %v32_v30 = vand.u32 3, %v78_v25 }
  0x8e   :  { %v30_v18 = vsub.f32 %v28_v16, %v29_v17  ;;  %v49_v35 = vand.u32 1, %v32_v30  ;;  %vm56_vm1 = vcmp.eq.s32.totalorder %v32_v30, 1  ;;  %vm57_vm2 = vcmp.eq.s32.totalorder %v32_v30, 2 }
  0x8f   :  { %vm53_vm3 = vcmp.ge.s32.totalorder %v32_v30, 2  ;;  %vm58_vm4 = vmor %vm56_vm1, %vm57_vm2 }
  0x90   :  { %v33_v19 = vmul.f32 %v30_v18, %v30_v18  ;;  %vm50_vm0 = vcmp.eq.s32.totalorder %v49_v35, 1 }
  0x92   :  { %v35_v21 = vmul.f32 -0.00019515296, %v33_v19  ;;  %v41_v22 = vmul.f32 2.4433157e-05, %v33_v19  ;;  %v34_v31 = vmul.f32 %v33_v19, %v30_v18 }
  0x94   :  { %v36_v23 = vadd.f32 0.008332161, %v35_v21  ;;  %v42_v24 = vadd.f32 -0.0013887316, %v41_v22 }
  0x96   :  { %v37_v26 = vmul.f32 %v36_v23, %v33_v19  ;;  %v43_v27 = vmul.f32 %v42_v24, %v33_v19 }
  0x98   :  { %v38_v28 = vadd.f32 -0.16666655, %v37_v26  ;;  %v44_v29 = vadd.f32 0.041666646, %v43_v27 }
  0x9a   :  { %v45_v32 = vmul.f32 %v44_v29, %v33_v19  ;;  %v39_v33 = vmul.f32 %v38_v28, %v34_v31 }
  0x9c   :  { %v46_v34 = vadd.f32 -0.5, %v45_v32  ;;  %v40_v37 = vadd.f32 %v39_v33, %v30_v18 }
  0x9e   :  { %v47_v36 = vmul.f32 %v46_v34, %v33_v19 }
  0xa0   :  { %v48_v38 = vadd.f32 1.0, %v47_v36 }
  0xa2   :  { %v51_v39 = vsel %vm50_vm0, %v48_v38, %v40_v37  ;;  %v52_v40 = vsel %vm50_vm0, %v40_v37, %v48_v38 }
  0xa3   :  { %v54_v41 = vsub.f32 0.0, %v51_v39  ;;  %v59_v42 = vsub.f32 0.0, %v52_v40 }
  0xa5   :  { %v55_v43 = vsel %vm53_vm3, %v54_v41, %v51_v39  ;;  %v60_v44 = vsel %vm58_vm4, %v59_v42, %v52_v40 }
  0xa6   :  { %61 = vst [vmem:[#allocation2] sm:$0xff] %v55_v43  ;;  %62 = vst [vmem:[#allocation2 + $0x8] sm:$0xff] %v60_v44 }
  0xa7   :  { %95 = shalt.err (!%p92_p4)
}
  0xa8   :  { %72 = dma.vmem_to_hbm [thread:$0]  %s70_s8, 256, %s125_s1, [#allocation3]  }
  0xa9   :  { %104 = dma.done.wait [#allocation3], 256  }
  0xaa   :  { %105 = vsyncadd [#allocation3], 4294967040 }
  0xab   :  { %76 = vsyncpa [#allocation3], 1 }

</bundles_post_ra>
